<compile_context>
chip_gen: v7x
topology: tpu7x:2x2x1
jax: 0.10.0
libtpu: 0.0.40
codegen_flags: <defaults>
</compile_context>

<pallas_src>
import functools

import jax
import jax.numpy as jnp
import numpy as np
from jax.experimental import pallas as pl
from jax.experimental.pallas import tpu as pltpu


def _round_up(x, m):
    return (x + m - 1) // m * m


# ----------------------------------------------------------------------------
# kernel: one batch tile per grid step; packed weights stay VMEM-resident.
# ----------------------------------------------------------------------------
def _differential_kernel(x_ref, w1_ref, w2_ref, out_ref, *, e_last_col, mp):
    x = x_ref[...]                                    # (TB, Kp) f32 input slab
    z = x.astype(w1_ref.dtype)                        # bf16 MXU operands

    # layer 1 (b1 folded into the constant-1 column of the slab)
    h = jnp.dot(z, w1_ref[...], preferred_element_type=jnp.float32)
    h = jnp.maximum(h, 0.0)                           # ReLU in f32

    # layer 2; channel-0 half of w2 already carries the cumulative sum, and b2
    # rides on the constant-1 hidden unit.
    d = jnp.dot(h.astype(w2_ref.dtype), w2_ref[...],
                preferred_element_type=jnp.float32)   # (TB, 2*Mp)

    # + energy_x[:, -1, -1] on the channel-0 half only (f32 straight from the slab)
    e_last = x[:, e_last_col:e_last_col + 1]          # (TB, 1)
    lane = jax.lax.broadcasted_iota(jnp.int32, d.shape, 1)
    d = d + jnp.where(lane < mp, e_last, 0.0)

    out_ref[...] = d.astype(out_ref.dtype)            # one unmasked lane-dense store


# ----------------------------------------------------------------------------
# wrapper
# ----------------------------------------------------------------------------
def differential_forward(energy_x, time_x, time_y, params, *,
                         compute_dtype=jnp.bfloat16, out_dtype=jnp.float32,
                         tb=None):
    B, x_seq, F = energy_x.shape
    y_seq, T_y = time_y.shape[1], time_y.shape[2]
    N = x_seq * F
    nx = time_x.shape[1] * time_x.shape[2]
    ny = y_seq * T_y
    K0 = N + nx + ny                          # inner-MLP input width

    w1, b1, w2, b2 = params["w1"], params["b1"], params["w2"], params["b2"]
    H = w1.shape[1]
    W_out = w2.shape[1] // (y_seq * 2)
    M = y_seq * W_out                         # per-channel flattened output width

    ones_col = K0                             # constant-1 column (carries b1)
    elast_col = K0 + 1                        # energy_x[:, -1, -1] column (offset)
    Kp = _round_up(K0 + 2, 16)                # contraction dim: x16 bf16 sublane packing
    Hp = _round_up(H + 1, 128)                # +1 hidden slot: constant-1 unit for b2
    Mp = _round_up(M, 128)                    # lane-dense per-channel output width

    if tb is None:
        tb = min(256, _round_up(B, 8))        # 256 fills the v6e/v7x 256^2 MXU
    else:
        tb = _round_up(tb, 8)
    Bp = _round_up(B, tb)

    f32 = jnp.float32

    # --- single lane-dense input slab [dif_x | time_x | time_y | 1 | e_last] -----
    e_flat = energy_x.reshape(B, N).astype(f32)
    dif_x = jnp.concatenate(
        [jnp.zeros((B, 1), f32), e_flat[:, 1:] - e_flat[:, :-1]], axis=1)
    slab = jnp.concatenate(
        [dif_x,
         time_x.reshape(B, nx).astype(f32),
         time_y.reshape(B, ny).astype(f32),
         jnp.ones((B, 1), f32),
         e_flat[:, N - 1:N]], axis=1)          # (B, K0 + 2)
    slab = jnp.pad(slab, ((0, Bp - B), (0, Kp - (K0 + 2))))

    # --- weight packing (host side, once) ----------------------------------------
    # Flat column of dif_y element (s, c, w) is s*2W + c*W + w.
    s = np.arange(y_seq)[:, None] * (2 * W_out) + np.arange(W_out)[None, :]
    idx0 = s.reshape(-1)                       # channel 0 — flatten order == cumsum order
    idx1 = (s + W_out).reshape(-1)             # channel 1

    w1f, b1f = w1.astype(f32), b1.astype(f32)
    w2f, b2f = w2.astype(f32), b2.astype(f32)

    w1_p = (jnp.zeros((Kp, Hp), f32)
            .at[:K0, :H].set(w1f)
            .at[ones_col, :H].set(b1f)         # b1 via the constant-1 input column
            .at[ones_col, H].set(1.0))         # hidden unit H == ReLU(1) == 1
    # cumulative sum folded into the channel-0 half of w2 (and of b2)
    w2_p = (jnp.zeros((Hp, 2 * Mp), f32)
            .at[:H, :M].set(jnp.cumsum(w2f[:, idx0], axis=1))
            .at[:H, Mp:Mp + M].set(w2f[:, idx1])
            .at[H, :M].set(jnp.cumsum(b2f[idx0]))
            .at[H, Mp:Mp + M].set(b2f[idx1]))

    w1_p = w1_p.astype(compute_dtype)          # only MXU operands are cast
    w2_p = w2_p.astype(compute_dtype)

    # --- VMEM budget: resident weights (x2 buffers) + double-buffered tiles ------
    wbytes = jnp.dtype(compute_dtype).itemsize
    obytes = jnp.dtype(out_dtype).itemsize
    need = (2 * (Kp * Hp + Hp * 2 * Mp) * wbytes
            + 2 * tb * Kp * 4 + 2 * tb * 2 * Mp * obytes)
    vmem_limit = int(min(max(2 * need, 32 * 1024 * 1024), 64 * 1024 * 1024))

    kernel = functools.partial(_differential_kernel, e_last_col=elast_col, mp=Mp)
    out = pl.pallas_call(
        kernel,
        out_shape=jax.ShapeDtypeStruct((Bp, 2 * Mp), out_dtype),
        grid_spec=pltpu.PrefetchScalarGridSpec(
            num_scalar_prefetch=0,
            grid=(Bp // tb,),
            in_specs=[
                pl.BlockSpec((tb, Kp), lambda i: (i, 0)),        # input slab
                pl.BlockSpec((Kp, Hp), lambda i: (0, 0)),        # w1 (resident)
                pl.BlockSpec((Hp, 2 * Mp), lambda i: (0, 0)),    # w2 (resident)
            ],
            out_specs=pl.BlockSpec((tb, 2 * Mp), lambda i: (i, 0)),
        ),
        compiler_params=pltpu.CompilerParams(
            dimension_semantics=("parallel",),
            vmem_limit_bytes=vmem_limit),
    )(slab, w1_p, w2_p)

    y = out[:B, :M].astype(f32).reshape(B, y_seq, 1, W_out)
    d1 = out[:B, Mp:Mp + M].astype(f32).reshape(B, y_seq, 1, W_out)
    return jnp.concatenate([y, d1], axis=2)    # (B, y_seq, 2, W_out)


# ----------------------- pure-JAX reference (module semantics) -----------------------
def differential_ref(energy_x, time_x, time_y, params, matmul_dtype=jnp.float32):
    B, x_seq, F = energy_x.shape
    y_seq = time_y.shape[1]
    W_out = params["w2"].shape[1] // (y_seq * 2)
    f32 = jnp.float32
    e = energy_x.reshape(B, -1).astype(f32)
    dif_x = jnp.concatenate([jnp.zeros((B, 1), f32), e[:, 1:] - e[:, :-1]], axis=1)
    z = jnp.concatenate([dif_x,
                         time_x.reshape(B, -1).astype(f32),
                         time_y.reshape(B, -1).astype(f32)], axis=1)
    h = jnp.dot(z.astype(matmul_dtype), params["w1"].astype(matmul_dtype),
                preferred_element_type=f32) + params["b1"].astype(f32)
    h = jnp.maximum(h, 0.0)
    dif_y = (jnp.dot(h.astype(matmul_dtype), params["w2"].astype(matmul_dtype),
                     preferred_element_type=f32) + params["b2"].astype(f32)
             ).reshape(B, y_seq, 2, W_out)
    y = (jnp.cumsum(dif_y[:, :, 0].reshape(B, -1), axis=-1)
         + energy_x[:, -1, -1].astype(f32)[:, None])
    return jnp.concatenate([y.reshape(B, y_seq, 1, W_out), dif_y[:, :, 1:2, :]], axis=2)


if __name__ == "__main__":
    B, x_seq, F = 2, 16, 4      # energy_x: (B, x_seq, F)
    T = 3                       # time feature width
    y_seq, W_out = 8, 4         # inner model output: (B, y_seq, 2, W_out)
    H = 32                      # MLP hidden size

    key = jax.random.PRNGKey(0)
    k1, k2, k3, k4, k5, k6, k7 = jax.random.split(key, 7)

    energy_x = jax.random.normal(k1, (B, x_seq, F), dtype=jnp.float32)
    time_x = jax.random.normal(k2, (B, x_seq, T), dtype=jnp.float32)
    time_y = jax.random.normal(k3, (B, y_seq, T), dtype=jnp.float32)

    in_dim = x_seq * F + x_seq * T + y_seq * T
    out_dim = y_seq * 2 * W_out
    params = {
        "w1": 0.1 * jax.random.normal(k4, (in_dim, H), dtype=jnp.float32),
        "b1": 0.1 * jax.random.normal(k5, (H,), dtype=jnp.float32),
        "w2": 0.1 * jax.random.normal(k6, (H, out_dim), dtype=jnp.float32),
        "b2": 0.1 * jax.random.normal(k7, (out_dim,), dtype=jnp.float32),
    }

    # f32 MXU path: the cumsum / bias folds are algebraically exact, so this must
    # match the exact module semantics tightly.
    out_f32 = jax.block_until_ready(
        differential_forward(energy_x, time_x, time_y, params,
                             compute_dtype=jnp.float32))
    ref = differential_ref(energy_x, time_x, time_y, params)
    assert out_f32.shape == (B, y_seq, 2, W_out), out_f32.shape
    np.testing.assert_allclose(np.asarray(out_f32), np.asarray(ref),
                               rtol=1e-4, atol=1e-4)

    # bf16 MXU path (default): bf16-rounding-level agreement with a bf16-operand
    # reference (the host-side cumsum fold reassociates bf16 rounding, hence the
    # rounding-level tolerance; any layout/permutation bug would be O(1) off).
    out_bf16 = jax.block_until_ready(
        differential_forward(energy_x, time_x, time_y, params))
    ref_bf16 = differential_ref(energy_x, time_x, time_y, params,
                                matmul_dtype=jnp.bfloat16)
    np.testing.assert_allclose(np.asarray(out_bf16), np.asarray(ref_bf16),
                               rtol=5e-2, atol=5e-2)

    print("KERNEL_OK")
</pallas_src>

<mosaic_0001>
module attributes {stable_mosaic.version = 11 : i64} {
  func.func @_differential_kernel(%arg0: i32, %arg1: memref<8x144xf32, #tpu.memory_space<vmem>>, %arg2: memref<144x128xf32, #tpu.memory_space<vmem>>, %arg3: memref<128x256xf32, #tpu.memory_space<vmem>>, %arg4: memref<8x256xf32, #tpu.memory_space<vmem>>) attributes {dimension_semantics = [#tpu.dimension_semantics<parallel>], iteration_bounds = array<i64: 1>, scalar_prefetch = 0 : i64, scratch_operands = 0 : i64, tpu.core_type = #tpu.core_type<tc>, window_params = [{transform_indices = @transform_0, window_bounds = array<i64: 8, 144>}, {pipeline_mode = #tpu.pipeline_mode<synchronous>, transform_indices = @transform_1, window_bounds = array<i64: 144, 128>}, {pipeline_mode = #tpu.pipeline_mode<synchronous>, transform_indices = @transform_2, window_bounds = array<i64: 128, 256>}, {transform_indices = @transform_3, window_bounds = array<i64: 8, 256>}]} {
    %c0 = arith.constant 0 : index
    %c0_0 = arith.constant 0 : index
    %0 = vector.load %arg1[%c0, %c0_0] : memref<8x144xf32, #tpu.memory_space<vmem>>, vector<8x144xf32>
    %c0_1 = arith.constant 0 : index
    %c0_2 = arith.constant 0 : index
    %1 = vector.load %arg2[%c0_1, %c0_2] : memref<144x128xf32, #tpu.memory_space<vmem>>, vector<144x128xf32>
    %cst = arith.constant dense<0.000000e+00> : vector<8x128xf32>
    %2 = tpu.matmul %0, %1, %cst {dimension_numbers = #tpu.dot_dimension_numbers<[1], [0], [0], [1], [0, 0, 1, 1], [], []>} : vector<8x144xf32>, vector<144x128xf32>, vector<8x128xf32> -> vector<8x128xf32>
    %cst_3 = arith.constant 0.000000e+00 : f32
    %3 = vector.broadcast %cst_3 : f32 to vector<8x128xf32>
    %4 = arith.maximumf %2, %3 : vector<8x128xf32>
    %c0_4 = arith.constant 0 : index
    %c0_5 = arith.constant 0 : index
    %5 = vector.load %arg3[%c0_4, %c0_5] : memref<128x256xf32, #tpu.memory_space<vmem>>, vector<128x256xf32>
    %cst_6 = arith.constant dense<0.000000e+00> : vector<8x256xf32>
    %6 = tpu.matmul %4, %5, %cst_6 {dimension_numbers = #tpu.dot_dimension_numbers<[1], [0], [0], [1], [0, 0, 1, 1], [], []>} : vector<8x128xf32>, vector<128x256xf32>, vector<8x256xf32> -> vector<8x256xf32>
    %7 = vector.extract_strided_slice %0 {offsets = [0, 137], sizes = [8, 1], strides = [1, 1]} : vector<8x144xf32> to vector<8x1xf32>
    %8 = tpu.iota {dimensions = array<i32: 1>} : vector<8x256xi32>
    %c128_i32 = arith.constant 128 : i32
    %9 = vector.broadcast %c128_i32 : i32 to vector<8x256xi32>
    %10 = arith.cmpi slt, %8, %9 : vector<8x256xi32>
    %cst_7 = arith.constant 0.000000e+00 : f32
    %11 = vector.shape_cast %7 : vector<8x1xf32> to vector<8x1xf32>
    %12 = vector.broadcast %11 : vector<8x1xf32> to vector<8x256xf32>
    %13 = vector.broadcast %cst_7 : f32 to vector<8x256xf32>
    %14 = arith.select %10, %12, %13 : vector<8x256xi1>, vector<8x256xf32>
    %15 = arith.addf %6, %14 : vector<8x256xf32>
    %c0_8 = arith.constant 0 : index
    %c0_9 = arith.constant 0 : index
    %16 = vector.load %arg4[%c0_8, %c0_9] : memref<8x256xf32, #tpu.memory_space<vmem>>, vector<8x256xf32>
    tpu.vector_store %arg4[%c0_8, %c0_9], %15 {strides = array<i32>} : memref<8x256xf32, #tpu.memory_space<vmem>>, vector<8x256xf32>,
    return
  }
  func.func @transform_0(%arg0: i32) -> (i32, i32) {
    %c0_i32 = arith.constant 0 : i32
    %c0_i32_0 = arith.constant 0 : i32
    return %arg0, %c0_i32 : i32, i32
  }
  func.func @transform_1(%arg0: i32) -> (i32, i32) {
    %c0_i32 = arith.constant 0 : i32
    %c0_i32_0 = arith.constant 0 : i32
    %c0_i32_1 = arith.constant 0 : i32
    return %c0_i32, %c0_i32_0 : i32, i32
  }
  func.func @transform_2(%arg0: i32) -> (i32, i32) {
    %c0_i32 = arith.constant 0 : i32
    %c0_i32_0 = arith.constant 0 : i32
    %c0_i32_1 = arith.constant 0 : i32
    return %c0_i32, %c0_i32_0 : i32, i32
  }
  func.func @transform_3(%arg0: i32) -> (i32, i32) {
    %c0_i32 = arith.constant 0 : i32
    %c0_i32_0 = arith.constant 0 : i32
    return %arg0, %c0_i32 : i32, i32
  }
}

</mosaic_0001>

<bundles_post_ra>
// kernel: tpu_custom_call.1
= control target key start
LH: loop header
LB: loop body
LE: loop exit
PB: predicated region body
PF: predicated region fallthrough
CT: control target
= control target key end

     0   :  { %8 = vsyncpa [#allocation3], 0  ;;  %s539_s0 = inlined_call_operand.hbm [shape: f32[8,144], index: 0, kind: input, shape index: {}]   ;;  %s540_s1 = inlined_call_operand.hbm [shape: f32[144,128], index: 1, kind: input, shape index: {}]   ;;  %s541_s2 = inlined_call_operand.hbm [shape: f32[128,256], index: 2, kind: input, shape index: {}]   ;;  %s542_s3 = inlined_call_operand.hbm [shape: f32[8,256], index: 3, kind: output, shape index: {}]  }
   0x1   :  { %9 = vsyncpa [#allocation6], 0 }
   0x2   :  { %10 = vsyncpa [#allocation4], 0  ;;  %s447_s12 = smov [#allocation5]   ;;  %s353_s16 = scalar_lea.hbm %s540_s1, 2304 }
   0x3   :  { %s26_s13 = sshll.u32 %s447_s12, 4  ;;  %p354_p0 = scmp.ne.s32.totalorder %s540_s1, %s353_s16  ;;  %s27_s13 = int_to_ptr.vmem [resolvable:$true] %s26_s13 }
   0x4   :  { %p357_p1 = scmp.lt.u32.totalorder %s353_s16, %s540_s1 }
   0x6   :  { %p359_p2 = pnand %p357_p1, %p354_p0 }
   0x8   :  { %362 = shalt.err (!%p359_p2)
}
   0x9   :  { %s363_s21 = scalar_lea.vmem %s27_s13, 2304  ;;  %p368_p4 = scmp.lt.s32.totalorder %s27_s13, %s27_s13 }
   0xa   :  { %p364_p3 = scmp.ne.s32.totalorder %s27_s13, %s363_s21  ;;  %p369_p5 = scmp.lt.s32.totalorder %s363_s21, %s363_s21 }
   0xc   :  { %p370_p6 = por %p369_p5, %p368_p4 }
   0xe   :  { %p371_p7 = pnand %p370_p6, %p364_p3 }
  0x10   :  { %374 = shalt.err (!%p371_p7)
}
  0x11   :  { %s448_s22 = smov 128   ;;  %s449_s23 = smov 8  }
  0x12   :  { %32 = dma.hbm_to_vmem [thread:$0]  %s540_s1, 2304, %s27_s13, [#allocation6], %s448_s22, %s448_s22, %s449_s23  }
  0x13   :  { %s450_s26 = smov [#allocation2]   ;;  %s451_s28 = smov [#allocation7]  }
  0x14   :  { %s17_s27 = sshll.u32 %s450_s26, 4  ;;  %s38_s29 = sshll.u32 %s451_s28, 4  ;;  %s18_s27 = int_to_ptr.vmem [resolvable:$true] %s17_s27  ;;  %s39_s29 = int_to_ptr.vmem [resolvable:$true] %s38_s29 }
  0x15   :  { %s375_s5 = scalar_lea.hbm %s539_s0, 256 }
  0x16   :  { %p376_p8 = scmp.ne.s32.totalorder %s539_s0, %s375_s5  ;;  %p379_p9 = scmp.lt.u32.totalorder %s375_s5, %s539_s0 }
  0x18   :  { %p381_p10 = pnand %p379_p9, %p376_p8 }
  0x1a   :  { %384 = shalt.err (!%p381_p10)
}
  0x1b   :  { %s385_s1 = scalar_lea.vmem %s18_s27, 256  ;;  %p390_p12 = scmp.lt.s32.totalorder %s18_s27, %s18_s27 }
  0x1c   :  { %p386_p11 = scmp.ne.s32.totalorder %s18_s27, %s385_s1  ;;  %p391_p13 = scmp.lt.s32.totalorder %s385_s1, %s385_s1 }
  0x1e   :  { %p392_p0 = por %p391_p13, %p390_p12 }
  0x20   :  { %p393_p1 = pnand %p392_p0, %p386_p11 }
  0x22   :  { %396 = shalt.err (!%p393_p1)
}
  0x23   :  { %20 = dma.hbm_to_vmem [thread:$0]  %s539_s0, 256, %s18_s27, [#allocation3]  }
  0x24   :  { %s397_s14 = scalar_lea.hbm %s541_s2, 4096 }
  0x25   :  { %p398_p2 = scmp.ne.s32.totalorder %s541_s2, %s397_s14  ;;  %p401_p3 = scmp.lt.u32.totalorder %s397_s14, %s541_s2 }
  0x27   :  { %p403_p4 = pnand %p401_p3, %p398_p2 }
  0x29   :  { %406 = shalt.err (!%p403_p4)
}
  0x2a   :  { %s407_s19 = scalar_lea.vmem %s39_s29, 4096  ;;  %p412_p6 = scmp.lt.s32.totalorder %s39_s29, %s39_s29 }
  0x2b   :  { %p408_p5 = scmp.ne.s32.totalorder %s39_s29, %s407_s19  ;;  %p413_p7 = scmp.lt.s32.totalorder %s407_s19, %s407_s19 }
  0x2d   :  { %p414_p8 = por %p413_p7, %p412_p6 }
  0x2f   :  { %p415_p9 = pnand %p414_p8, %p408_p5 }
  0x31   :  { %418 = shalt.err (!%p415_p9)
}
  0x32   :  { %s452_s0 = smov 256   ;;  %s453_s20 = smov 16  }
  0x33   :  { %44 = dma.hbm_to_vmem [thread:$0]  %s541_s2, 4096, %s39_s29, [#allocation6], %s452_s0, %s452_s0, %s453_s20  }
  0x34   :  { %441 = dma.done.wait [#allocation3], 256  }
  0x35   :  { %442 = vsyncadd [#allocation3], 4294967040 }
  0x36   :  { %443 = dma.done.wait [#allocation6], 6400  }
  0x37   :  { %444 = vsyncadd [#allocation6], 4294960896  ;;  %v454_v0 = vmov 0.0|0.0   ;;  %v56_v1 = vld [vmem:[#allocation5] sm:$0xff]  ;;  %v57_v2 = vld [vmem:[#allocation5 + $0x8] sm:$0xff]  ;;  %vm74_vm0 = vcmask 130048  }
  0x38   :  { %282 = vmatprep.subr.bf16.mxu0 %v454_v0  ;;  %v58_v3 = vld [vmem:[#allocation5 + $0x10] sm:$0xff]  ;;  %v283_v4 = vpack.c.bf16 %v57_v2, %v56_v1  ;;  %v59_v5 = vld [vmem:[#allocation5 + $0x18] sm:$0xff]  ;;  %v60_v7 = vld [vmem:[#allocation5 + $0x20] sm:$0xff]  ;;  %s457_s2 = smov [#allocation8]  }
  0x39   :  { %v286_v6 = vpack.c.bf16 %v59_v5, %v58_v3  ;;  %v61_v8 = vld [vmem:[#allocation5 + $0x28] sm:$0xff]  ;;  %v62_v9 = vld [vmem:[#allocation5 + $0x30] sm:$0xff]  ;;  %v63_v10 = vld [vmem:[#allocation5 + $0x38] sm:$0xff]  ;;  %s271_s23 = sshll.u32 %s457_s2, 4  ;;  %s272_s23 = int_to_ptr.vmem [resolvable:$true] %s271_s23 }
  0x3a   :  { %284 = vmatpush1.bf16.msra.mxu0 %v283_v4  ;;  %v516_v11 = vld [vmem:[#allocation2 + $0x8] sm:$0xff]  ;;  %v289_v13 = vpack.c.bf16 %v61_v8, %v60_v7  ;;  %v152_v14 = vld [vmem:[#allocation7 + $0x18] sm:$0xff]  ;;  %v149_v15 = vld [vmem:[#allocation7] sm:$0xff]  ;;  %v292_v26 = vpack.c.bf16 %v63_v10, %v62_v9  ;;  %s419_s24 = scalar_lea.vmem %s272_s23, 256  ;;  %p424_p11 = scmp.lt.s32.totalorder %s272_s23, %s272_s23 }
  0x3b   :  { %285 = vmatprep.subr.bf16.mxu0 %v454_v0  ;;  %v150_v12 = vld [vmem:[#allocation7 + $0x8] sm:$0xff]  ;;  %281 = vmatprep.mubr.msk.f32.mxu0 %vm74_vm0, %v516_v11  ;;  %v151_v16 = vld [vmem:[#allocation7 + $0x10] sm:$0xff]  ;;  %v156_v20 = vld [vmem:[#allocation7 + $0x38] sm:$0xff]  ;;  %p420_p10 = scmp.ne.s32.totalorder %s272_s23, %s419_s24  ;;  %p425_p12 = scmp.lt.s32.totalorder %s419_s24, %s419_s24 }
  0x3c   :  { %v309_v17 = vpack.c.bf16 %v152_v14, %v150_v12  ;;  %v311_v18 = vpack.c.bf16 %v151_v16, %v149_v15  ;;  %v154_v19 = vld [vmem:[#allocation7 + $0x28] sm:$0xff]  ;;  %v153_v21 = vld [vmem:[#allocation7 + $0x20] sm:$0xff]  ;;  %v155_v23 = vld [vmem:[#allocation7 + $0x30] sm:$0xff]  ;;  %v455_v16 = vmov 0.0  }
  0x3d   :  { %v313_v22 = vpack.c.bf16 %v156_v20, %v154_v19  ;;  %v158_v24 = vld [vmem:[#allocation7 + $0x48] sm:$0xff]  ;;  %v160_v25 = vld [vmem:[#allocation7 + $0x58] sm:$0xff]  ;;  %v64_v27 = vld [vmem:[#allocation5 + $0x40] sm:$0xff]  ;;  %v315_v28 = vpack.c.bf16 %v155_v23, %v153_v21  ;;  %256 = vmatprep.mubr.f32.mxu1 %v455_v16  ;;  %p426_p13 = por %p425_p12, %p424_p11 }
  0x3e   :  { %287 = vmatpush1.bf16.msra.mxu0 %v286_v6  ;;  %310 = vmatprep.subr.bf16.mxu1 %v309_v17  ;;  %v65_v29 = vld [vmem:[#allocation5 + $0x48] sm:$0xff]  ;;  %v317_v30 = vpack.c.bf16 %v160_v25, %v158_v24  ;;  %v157_v31 = vld [vmem:[#allocation7 + $0x40] sm:$0xff]  ;;  %v159_v32 = vld [vmem:[#allocation7 + $0x50] sm:$0xff]  ;;  %v456_v17 = vmov 9  }
  0x3f   :  { %288 = vmatprep.subr.bf16.mxu0 %v454_v0  ;;  %312 = vmatpush1.bf16.msra.mxu1 %v311_v18  ;;  %v162_v33 = vld [vmem:[#allocation7 + $0x68] sm:$0xff]  ;;  %v164_v34 = vld [vmem:[#allocation7 + $0x78] sm:$0xff]  ;;  %v295_v35 = vpack.c.bf16 %v65_v29, %v64_v27  ;;  %v66_v36 = vld [vmem:[#allocation5 + $0x50] sm:$0xff]  ;;  %v319_v37 = vpack.c.bf16 %v159_v32, %v157_v31  ;;  %p427_p0 = pnand %p426_p13, %p420_p10 }
  0x40   :  { %314 = vmatprep.subr.bf16.mxu1 %v313_v22  ;;  %v67_v38 = vld [vmem:[#allocation5 + $0x58] sm:$0xff]  ;;  %v321_v39 = vpack.c.bf16 %v164_v34, %v162_v33  ;;  %v161_v40 = vld [vmem:[#allocation7 + $0x60] sm:$0xff]  ;;  %v163_v41 = vld [vmem:[#allocation7 + $0x70] sm:$0xff]  ;;  %352 = vset.pattern.permute.xlu0 %v456_v17 }
  0x41   :  { %v166_v42 = vld [vmem:[#allocation7 + $0x88] sm:$0xff]  ;;  %v168_v43 = vld [vmem:[#allocation7 + $0x98] sm:$0xff]  ;;  %v298_v44 = vpack.c.bf16 %v67_v38, %v66_v36  ;;  %v68_v45 = vld [vmem:[#allocation5 + $0x60] sm:$0xff]  ;;  %v323_v46 = vpack.c.bf16 %v163_v41, %v161_v40  ;;  %187 = vperm.xlu0 %352, %v516_v11  }
  0x42   :  { %290 = vmatpush1.bf16.msra.mxu0 %v289_v13  ;;  %v69_v47 = vld [vmem:[#allocation5 + $0x68] sm:$0xff]  ;;  %v325_v48 = vpack.c.bf16 %v168_v43, %v166_v42  ;;  %v165_v49 = vld [vmem:[#allocation7 + $0x80] sm:$0xff]  ;;  %v167_v50 = vld [vmem:[#allocation7 + $0x90] sm:$0xff] }
  0x43   :  { %291 = vmatprep.subr.bf16.mxu0 %v454_v0  ;;  %316 = vmatpush1.bf16.msra.mxu1 %v315_v28  ;;  %v170_v51 = vld [vmem:[#allocation7 + $0xa8] sm:$0xff]  ;;  %v172_v52 = vld [vmem:[#allocation7 + $0xb8] sm:$0xff]  ;;  %v301_v53 = vpack.c.bf16 %v69_v47, %v68_v45  ;;  %v70_v54 = vld [vmem:[#allocation5 + $0x70] sm:$0xff]  ;;  %v327_v55 = vpack.c.bf16 %v167_v50, %v165_v49 }
  0x44   :  { %318 = vmatprep.subr.bf16.mxu1 %v317_v30  ;;  %v71_v56 = vld [vmem:[#allocation5 + $0x78] sm:$0xff]  ;;  %v329_v57 = vpack.c.bf16 %v172_v52, %v170_v51  ;;  %v169_v58 = vld [vmem:[#allocation7 + $0xa0] sm:$0xff]  ;;  %v171_v59 = vld [vmem:[#allocation7 + $0xb0] sm:$0xff] }
  0x45   :  { %v174_v60 = vld [vmem:[#allocation7 + $0xc8] sm:$0xff]  ;;  %v176_v61 = vld [vmem:[#allocation7 + $0xd8] sm:$0xff]  ;;  %v304_v62 = vpack.c.bf16 %v71_v56, %v70_v54  ;;  %v72_v63 = vld [vmem:[#allocation5 + $0x80] sm:$0xff]  ;;  %v331_v1 = vpack.c.bf16 %v171_v59, %v169_v58 }
  0x46   :  { %293 = vmatpush1.bf16.msra.mxu0 %v292_v26  ;;  %v73_v2 = vld [vmem:[#allocation5 + $0x88] sm:$0xff]  ;;  %v333_v3 = vpack.c.bf16 %v176_v61, %v174_v60  ;;  %v173_v4 = vld [vmem:[#allocation7 + $0xc0] sm:$0xff]  ;;  %v175_v5 = vld [vmem:[#allocation7 + $0xd0] sm:$0xff] }
  0x47   :  { %294 = vmatprep.subr.bf16.mxu0 %v454_v0  ;;  %320 = vmatpush1.bf16.msra.mxu1 %v319_v37  ;;  %v178_v6 = vld [vmem:[#allocation7 + $0xe8] sm:$0xff]  ;;  %v180_v7 = vld [vmem:[#allocation7 + $0xf8] sm:$0xff]  ;;  %v307_v8 = vpack.c.bf16 %v73_v2, %v72_v63  ;;  %v335_v9 = vpack.c.bf16 %v175_v5, %v173_v4  ;;  %v54_v12 = vld [vmem:[#allocation2] sm:$0xff] }
  0x48   :  { %322 = vmatprep.subr.bf16.mxu1 %v321_v39  ;;  %v337_v10 = vpack.c.bf16 %v180_v7, %v178_v6  ;;  %v177_v13 = vld [vmem:[#allocation7 + $0xe0] sm:$0xff]  ;;  %v179_v14 = vld [vmem:[#allocation7 + $0xf0] sm:$0xff] }
  0x49   :  { %v339_v15 = vpack.c.bf16 %v179_v14, %v177_v13 }
  0x4a   :  { %296 = vmatpush1.bf16.msra.mxu0 %v295_v35 }
  0x4b   :  { %297 = vmatprep.subr.bf16.mxu0 %v454_v0  ;;  %324 = vmatpush1.bf16.msra.mxu1 %v323_v46 }
  0x4c   :  { %326 = vmatprep.subr.bf16.mxu1 %v325_v48 }
  0x4e   :  { %299 = vmatpush1.bf16.msra.mxu0 %v298_v44 }
  0x4f   :  { %300 = vmatprep.subr.bf16.mxu0 %v454_v0  ;;  %328 = vmatpush1.bf16.msra.mxu1 %v327_v55 }
  0x50   :  { %330 = vmatprep.subr.bf16.mxu1 %v329_v57 }
  0x52   :  { %302 = vmatpush1.bf16.msra.mxu0 %v301_v53 }
  0x53   :  { %303 = vmatprep.subr.bf16.mxu0 %v454_v0  ;;  %332 = vmatpush1.bf16.msra.mxu1 %v331_v1 }
  0x54   :  { %334 = vmatprep.subr.bf16.mxu1 %v333_v3 }
  0x56   :  { %305 = vmatpush1.bf16.msra.mxu0 %v304_v62 }
  0x57   :  { %306 = vmatprep.subr.bf16.mxu0 %v454_v0  ;;  %336 = vmatpush1.bf16.msra.mxu1 %v335_v9 }
  0x58   :  { %338 = vmatprep.subr.bf16.mxu1 %v337_v10 }
  0x5a   :  { %308 = vmatpush1.bf16.msra.mxu0 %v307_v8 }
  0x5b   :  { %340 = vmatpush1.bf16.msra.mxu1 %v339_v15 }
  0x5d   :  { %143 = vmatmul.mubr.f32.vlgmr.msra.gmra.mrb[0].mxu0 %v54_v12 }
  0xc0   :  { %v188_v20 = vpop.permute.xlu0 %187 }
 0x130   :  { %v144_v18 = vpop.f32.mrb[0].mxu0 }
 0x131   :  { %v148_v19 = vmax.f32 %v144_v18, 0.0  ;;  %v146_v0 = vpop.f32.mrb[1].mxu0 }
 0x133   :  { %257 = vmatmul.mubr.f32.vlgmr.msra.gmra.mrb[0].mxu1 %v148_v19 }
 0x206   :  { %v258_v21 = vpop.f32.mrb[0].mxu1 }
 0x207   :  { %v259_v22 = vadd.f32 %v258_v21, %v188_v20  ;;  %v260_v23 = vpop.f32.mrb[1].mxu1 }
 0x208   :  { %264 = vst [vmem:[#allocation8 + $0x8] sm:$0xff] %v260_v23 }
 0x209   :  { %263 = vst [vmem:[#allocation8] sm:$0xff] %v259_v22 }
 0x20a   :  { %430 = shalt.err (!%p427_p0)
}
 0x20b   :  { %s431_s27 = scalar_lea.hbm %s542_s3, 256 }
 0x20c   :  { %p432_p1 = scmp.ne.s32.totalorder %s542_s3, %s431_s27  ;;  %p435_p2 = scmp.lt.u32.totalorder %s431_s27, %s542_s3 }
 0x20e   :  { %p437_p3 = pnand %p435_p2, %p432_p1 }
 0x210   :  { %440 = shalt.err (!%p437_p3)
}
 0x211   :  { %274 = dma.vmem_to_hbm [thread:$0]  %s272_s23, 256, %s542_s3, [#allocation4]  }
 0x212   :  { %445 = dma.done.wait [#allocation4], 256  }
 0x213   :  { %446 = vsyncadd [#allocation4], 4294967040 }
 0x214   :  { %278 = vsyncpa [#allocation3], 1 }
 0x215   :  { %279 = vsyncpa [#allocation6], 1 }
 0x216   :  { %280 = vsyncpa [#allocation4], 1 }

</bundles_post_ra>
